<compile_context>
chip_gen: v6e
topology: v6e:2x2x1
jax: 0.10.0
libtpu: 0.0.40
codegen_flags: <defaults>
</compile_context>

<pallas_src>
import functools

import jax
import jax.numpy as jnp
from jax.experimental import pallas as pl
from jax.experimental.pallas import tpu as pltpu

LANE = 128       # lane width (last-dim alignment)
BATCH_ALIGN = 16  # bf16 sublane packing for the LHS


def _round_up(n, m):
    return ((n + m - 1) // m) * m


def _choose_batch_tile(B):
    """Batch tile: <=256 rows, multiple of 16, >=2 grid steps when B is nontrivial."""
    n_tiles = max(1, -(-B // 256))
    if B >= 32 and n_tiles < 2:
        n_tiles = 2            # let v7x shard the parallel axis across both TCs
    tb = -(-B // n_tiles)
    return max(BATCH_ALIGN, _round_up(tb, BATCH_ALIGN))


def _mlp_fused_kernel(x_ref, *refs, num_layers, acts, out_pdims, final_valid):
    """Whole MLP on one [TB, D0_pad] activation tile.

    refs layout: w0, w1, ..., w_{L-1}, bias_all, o_ref
      weights : bf16 (Din_pad, Dout_pad), VMEM-resident (constant index_map)
      bias_all: f32  (L, max_Dout_pad)
    Intermediates live as traced values (vregs / compiler-managed VMEM); nothing
    touches HBM between layers.
    """
    o_ref = refs[-1]
    bias_ref = refs[num_layers]          # (L, max_dpo) f32
    h = x_ref[...]                       # bf16 [TB, D0_pad]
    for i in range(num_layers):
        w = refs[i][...]                 # bf16 [Din_pad, Dout_pad]
        dpo = out_pdims[i]
        b = bias_ref[i:i + 1, :dpo]      # f32 (1, dpo), static slice
        y = jnp.dot(h, w, preferred_element_type=jnp.float32) + b
        act = acts[i]
        if act == "relu":
            # keep the inter-layer activation in bf16 (halves live footprint)
            h = jnp.maximum(y, 0.0).astype(jnp.bfloat16)
        elif act == "sigmoid":
            # one EUP transcendental; stable for very negative y
            h = 0.5 * jnp.tanh(0.5 * y) + 0.5
        elif act == "logsoftmax":
            # Mask zero-padded feature columns with a large finite negative so
            # the padded output buffer never contains -inf / NaN.
            col = jax.lax.broadcasted_iota(jnp.int32, y.shape, dimension=1)
            y = jnp.where(col < final_valid, y, -1e30)
            m = jnp.max(y, axis=-1, keepdims=True)
            z = y - m
            h = z - jnp.log(jnp.sum(jnp.exp(z), axis=-1, keepdims=True))
        else:  # "none"
            h = y
    o_ref[...] = h.astype(o_ref.dtype)


def init_mlp_params(key, layers):
    """Deterministic init matching nn.Linear shapes (weights stored (in, out))."""
    params = []
    for i in range(1, len(layers)):
        fan_in, fan_out = layers[i - 1], layers[i]
        key, kw, kb = jax.random.split(key, 3)
        bound = 1.0 / jnp.sqrt(float(fan_in))
        w = jax.random.uniform(kw, (fan_in, fan_out), jnp.float32, -bound, bound)
        b = jax.random.uniform(kb, (1, fan_out), jnp.float32, -bound, bound)
        params.append((w, b))
    return params


def prepare_params(params):
    """One-time padding + bf16 cast, hoisted out of the forward path."""
    n = len(params)
    dims = [params[0][0].shape[0]] + [w.shape[1] for (w, _) in params]
    pdims = [_round_up(d, LANE) for d in dims]
    max_dpo = max(pdims[1:])

    w_pads = []
    for li, (w, _) in enumerate(params):
        din, dout = w.shape
        dpi, dpo = pdims[li], pdims[li + 1]
        w_pads.append(
            jnp.zeros((dpi, dpo), jnp.bfloat16).at[:din, :dout]
            .set(w.astype(jnp.bfloat16)))

    # Pack all biases into a single (L, max_dpo) f32 array.
    b_all = jnp.zeros((n, max_dpo), jnp.float32)
    for li, (_, b) in enumerate(params):
        b_all = b_all.at[li, :dims[li + 1]].set(b.reshape(-1))

    jax.block_until_ready((w_pads, b_all))
    return {"w": w_pads, "b": b_all, "dims": tuple(dims), "pdims": tuple(pdims)}


def mlp_forward(x, prepped, last_layer=None, tb=None):
    """Mirrors MLP.forward with a single fused Pallas kernel.

    x: [B, Din] f32.  prepped: output of prepare_params().
    """
    dims, pdims = prepped["dims"], prepped["pdims"]
    w_pads, b_all = prepped["w"], prepped["b"]
    n = len(w_pads)
    B, din0 = x.shape
    assert din0 == dims[0]

    if tb is None:
        tb = _choose_batch_tile(B)
    tb = max(BATCH_ALIGN, _round_up(tb, BATCH_ALIGN))
    b_pad = _round_up(B, tb)

    # bf16 input tile: weights are bf16 anyway, halves x HBM traffic.
    x_pad = (jnp.zeros((b_pad, pdims[0]), jnp.bfloat16)
             .at[:B, :din0].set(x.astype(jnp.bfloat16)))

    acts = tuple(["relu"] * (n - 1)
                 + (["logsoftmax"] if last_layer else ["sigmoid"]))
    kernel = functools.partial(
        _mlp_fused_kernel,
        num_layers=n,
        acts=acts,
        out_pdims=tuple(pdims[1:]),
        final_valid=dims[-1],
    )

    # --- VMEM budget -------------------------------------------------------
    max_dpo = b_all.shape[1]
    weight_bytes = sum(w.size * 2 for w in w_pads) + b_all.size * 4  # 1 buffer
    act_io_bytes = 2 * tb * pdims[0] * 2 + 2 * tb * pdims[-1] * 4    # dbl-buffered
    inter_bytes = 2 * tb * max(pdims) * 4                            # live y/h slack
    vmem_needed = weight_bytes + act_io_bytes + inter_bytes
    vmem_limit = int(min(max(2 * vmem_needed, 32 << 20), 100 << 20))
    # TODO(synk): if weight_bytes alone exceeds the chip VMEM (~64 MiB on v7x),
    # split the largest layer's K dim with pltpu.emit_pipeline instead of
    # keeping every weight matrix resident.

    flops = 2 * b_pad * sum(pdims[i] * pdims[i + 1] for i in range(n))
    bytes_accessed = (b_pad * pdims[0] * 2 + weight_bytes + b_pad * pdims[-1] * 4)
    transcendentals = b_pad * pdims[-1]

    def _call(use_single_buffer):
        const_kw = ({"pipeline_mode": pl.Buffered(1)}
                    if use_single_buffer else {})
        in_specs = [pl.BlockSpec((tb, pdims[0]), lambda i: (i, 0))]
        for li in range(n):
            dpi, dpo = pdims[li], pdims[li + 1]
            # Constant index_map -> weights stay VMEM-resident across the grid.
            in_specs.append(pl.BlockSpec((dpi, dpo), lambda i: (0, 0), **const_kw))
        in_specs.append(pl.BlockSpec((n, max_dpo), lambda i: (0, 0), **const_kw))
        return pl.pallas_call(
            kernel,
            out_shape=jax.ShapeDtypeStruct((b_pad, pdims[-1]), jnp.float32),
            grid=(b_pad // tb,),
            in_specs=in_specs,
            out_specs=pl.BlockSpec((tb, pdims[-1]), lambda i: (i, 0)),
            compiler_params=pltpu.CompilerParams(
                dimension_semantics=("parallel",),
                vmem_limit_bytes=vmem_limit,
            ),
            cost_estimate=pl.CostEstimate(
                flops=flops,
                transcendentals=transcendentals,
                bytes_accessed=bytes_accessed,
            ),
        )(x_pad, *w_pads, b_all)

    try:
        out_pad = _call(True)
    except Exception:
        # Fallback if this JAX build rejects single-buffered constant blocks.
        out_pad = _call(False)

    return out_pad[:B, :dims[-1]]


def _mlp_reference(x, params, last_layer=None):
    """Pure-JAX f32 reference (same math as the PyTorch module)."""
    n = len(params)
    h = x
    for i, (w, b) in enumerate(params):
        h = h @ w + b
        if i < n - 1:
            h = jnp.maximum(h, 0.0)
    if last_layer:
        return jax.nn.log_softmax(h, axis=-1)
    return jax.nn.sigmoid(h)


if __name__ == "__main__":
    # Small shapes consistent with the module: layers = [in, hidden..., out]
    layers = [32, 64, 48, 16]
    batch = 8

    key = jax.random.PRNGKey(0)
    key, kx = jax.random.split(key)
    x = jax.random.normal(kx, (batch, layers[0]), dtype=jnp.float32)
    params = init_mlp_params(key, layers)
    prepped = prepare_params(params)   # one-time padding + bf16 cast

    # Default path (last_layer=None -> Sigmoid)
    out = mlp_forward(x, prepped, last_layer=None)
    out = jax.block_until_ready(out)
    assert out.shape == (batch, layers[-1])

    # LogSoftmax branch (last_layer truthy)
    out_ls = mlp_forward(x, prepped, last_layer=True)
    out_ls = jax.block_until_ready(out_ls)
    assert out_ls.shape == (batch, layers[-1])

    # Sanity vs f32 reference (loose tolerance: weights/activations fed as bf16).
    ref = _mlp_reference(x, params, last_layer=None)
    ref_ls = _mlp_reference(x, params, last_layer=True)
    assert float(jnp.max(jnp.abs(out - ref))) < 5e-2
    assert float(jnp.max(jnp.abs(out_ls - ref_ls))) < 5e-2
    assert bool(jnp.all(jnp.isfinite(out))) and bool(jnp.all(jnp.isfinite(out_ls)))

    print("KERNEL_OK")
</pallas_src>

<mosaic_0001>
module attributes {stable_mosaic.version = 11 : i64} {
  func.func @_mlp_fused_kernel(%arg0: i32, %arg1: memref<16x128xbf16, #tpu.memory_space<vmem>>, %arg2: memref<128x128xbf16, #tpu.memory_space<vmem>>, %arg3: memref<128x128xbf16, #tpu.memory_space<vmem>>, %arg4: memref<128x128xbf16, #tpu.memory_space<vmem>>, %arg5: memref<3x128xf32, #tpu.memory_space<vmem>>, %arg6: memref<16x128xf32, #tpu.memory_space<vmem>>) attributes {dimension_semantics = [#tpu.dimension_semantics<parallel>], iteration_bounds = array<i64: 1>, scalar_prefetch = 0 : i64, scratch_operands = 0 : i64, tpu.core_type = #tpu.core_type<tc>, window_params = [{transform_indices = @transform_0, window_bounds = array<i64: 16, 128>}, {pipeline_mode = #tpu.pipeline_mode<synchronous>, transform_indices = @transform_1, window_bounds = array<i64: 128, 128>}, {pipeline_mode = #tpu.pipeline_mode<synchronous>, transform_indices = @transform_2, window_bounds = array<i64: 128, 128>}, {pipeline_mode = #tpu.pipeline_mode<synchronous>, transform_indices = @transform_3, window_bounds = array<i64: 128, 128>}, {pipeline_mode = #tpu.pipeline_mode<synchronous>, transform_indices = @transform_4, window_bounds = array<i64: 3, 128>}, {transform_indices = @transform_5, window_bounds = array<i64: 16, 128>}]} {
    %c0 = arith.constant 0 : index
    %c0_0 = arith.constant 0 : index
    %0 = vector.load %arg1[%c0, %c0_0] : memref<16x128xbf16, #tpu.memory_space<vmem>>, vector<16x128xbf16>
    %c0_1 = arith.constant 0 : index
    %c0_2 = arith.constant 0 : index
    %1 = vector.load %arg2[%c0_1, %c0_2] : memref<128x128xbf16, #tpu.memory_space<vmem>>, vector<128x128xbf16>
    %c0_3 = arith.constant 0 : index
    %c0_4 = arith.constant 0 : index
    %2 = vector.load %arg5[%c0_3, %c0_4] : memref<3x128xf32, #tpu.memory_space<vmem>>, vector<1x128xf32>
    %cst = arith.constant dense<0.000000e+00> : vector<16x128xf32>
    %3 = tpu.matmul %0, %1, %cst {dimension_numbers = #tpu.dot_dimension_numbers<[1], [0], [0], [1], [0, 0, 1, 1], [], []>} : vector<16x128xbf16>, vector<128x128xbf16>, vector<16x128xf32> -> vector<16x128xf32>
    %4 = vector.broadcast %2 : vector<1x128xf32> to vector<16x128xf32>
    %5 = arith.addf %3, %4 : vector<16x128xf32>
    %cst_5 = arith.constant 0.000000e+00 : f32
    %6 = vector.broadcast %cst_5 : f32 to vector<16x128xf32>
    %7 = arith.maximumf %5, %6 : vector<16x128xf32>
    %8 = arith.truncf %7 : vector<16x128xf32> to vector<16x128xbf16>
    %c0_6 = arith.constant 0 : index
    %c0_7 = arith.constant 0 : index
    %9 = vector.load %arg3[%c0_6, %c0_7] : memref<128x128xbf16, #tpu.memory_space<vmem>>, vector<128x128xbf16>
    %c1 = arith.constant 1 : index
    %c0_8 = arith.constant 0 : index
    %10 = vector.load %arg5[%c1, %c0_8] : memref<3x128xf32, #tpu.memory_space<vmem>>, vector<1x128xf32>
    %cst_9 = arith.constant dense<0.000000e+00> : vector<16x128xf32>
    %11 = tpu.matmul %8, %9, %cst_9 {dimension_numbers = #tpu.dot_dimension_numbers<[1], [0], [0], [1], [0, 0, 1, 1], [], []>} : vector<16x128xbf16>, vector<128x128xbf16>, vector<16x128xf32> -> vector<16x128xf32>
    %12 = vector.broadcast %10 : vector<1x128xf32> to vector<16x128xf32>
    %13 = arith.addf %11, %12 : vector<16x128xf32>
    %cst_10 = arith.constant 0.000000e+00 : f32
    %14 = vector.broadcast %cst_10 : f32 to vector<16x128xf32>
    %15 = arith.maximumf %13, %14 : vector<16x128xf32>
    %16 = arith.truncf %15 : vector<16x128xf32> to vector<16x128xbf16>
    %c0_11 = arith.constant 0 : index
    %c0_12 = arith.constant 0 : index
    %17 = vector.load %arg4[%c0_11, %c0_12] : memref<128x128xbf16, #tpu.memory_space<vmem>>, vector<128x128xbf16>
    %c2 = arith.constant 2 : index
    %c0_13 = arith.constant 0 : index
    %18 = vector.load %arg5[%c2, %c0_13] : memref<3x128xf32, #tpu.memory_space<vmem>>, vector<1x128xf32>
    %cst_14 = arith.constant dense<0.000000e+00> : vector<16x128xf32>
    %19 = tpu.matmul %16, %17, %cst_14 {dimension_numbers = #tpu.dot_dimension_numbers<[1], [0], [0], [1], [0, 0, 1, 1], [], []>} : vector<16x128xbf16>, vector<128x128xbf16>, vector<16x128xf32> -> vector<16x128xf32>
    %20 = vector.broadcast %18 : vector<1x128xf32> to vector<16x128xf32>
    %21 = arith.addf %19, %20 : vector<16x128xf32>
    %cst_15 = arith.constant 5.000000e-01 : f32
    %22 = vector.broadcast %cst_15 : f32 to vector<16x128xf32>
    %23 = arith.mulf %22, %21 : vector<16x128xf32>
    %24 = math.tanh %23 : vector<16x128xf32>
    %cst_16 = arith.constant 5.000000e-01 : f32
    %25 = vector.broadcast %cst_16 : f32 to vector<16x128xf32>
    %26 = arith.mulf %25, %24 : vector<16x128xf32>
    %cst_17 = arith.constant 5.000000e-01 : f32
    %27 = vector.broadcast %cst_17 : f32 to vector<16x128xf32>
    %28 = arith.addf %26, %27 : vector<16x128xf32>
    %c0_18 = arith.constant 0 : index
    %c0_19 = arith.constant 0 : index
    %29 = vector.load %arg6[%c0_18, %c0_19] : memref<16x128xf32, #tpu.memory_space<vmem>>, vector<16x128xf32>
    tpu.vector_store %arg6[%c0_18, %c0_19], %28 {strides = array<i32>} : memref<16x128xf32, #tpu.memory_space<vmem>>, vector<16x128xf32>,
    return
  }
  func.func @transform_0(%arg0: i32) -> (i32, i32) {
    %c0_i32 = arith.constant 0 : i32
    %c0_i32_0 = arith.constant 0 : i32
    return %arg0, %c0_i32 : i32, i32
  }
  func.func @transform_1(%arg0: i32) -> (i32, i32) {
    %c0_i32 = arith.constant 0 : i32
    %c0_i32_0 = arith.constant 0 : i32
    %c0_i32_1 = arith.constant 0 : i32
    return %c0_i32, %c0_i32_0 : i32, i32
  }
  func.func @transform_2(%arg0: i32) -> (i32, i32) {
    %c0_i32 = arith.constant 0 : i32
    %c0_i32_0 = arith.constant 0 : i32
    %c0_i32_1 = arith.constant 0 : i32
    return %c0_i32, %c0_i32_0 : i32, i32
  }
  func.func @transform_3(%arg0: i32) -> (i32, i32) {
    %c0_i32 = arith.constant 0 : i32
    %c0_i32_0 = arith.constant 0 : i32
    %c0_i32_1 = arith.constant 0 : i32
    return %c0_i32, %c0_i32_0 : i32, i32
  }
  func.func @transform_4(%arg0: i32) -> (i32, i32) {
    %c0_i32 = arith.constant 0 : i32
    %c0_i32_0 = arith.constant 0 : i32
    %c0_i32_1 = arith.constant 0 : i32
    return %c0_i32, %c0_i32_0 : i32, i32
  }
  func.func @transform_5(%arg0: i32) -> (i32, i32) {
    %c0_i32 = arith.constant 0 : i32
    %c0_i32_0 = arith.constant 0 : i32
    return %arg0, %c0_i32 : i32, i32
  }
}

module attributes {stable_mosaic.version = 11 : i64} {
  func.func @_mlp_fused_kernel(%arg0: i32, %arg1: memref<16x128xbf16, #tpu.memory_space<vmem>>, %arg2: memref<128x128xbf16, #tpu.memory_space<vmem>>, %arg3: memref<128x128xbf16, #tpu.memory_space<vmem>>, %arg4: memref<128x128xbf16, #tpu.memory_space<vmem>>, %arg5: memref<3x128xf32, #tpu.memory_space<vmem>>, %arg6: memref<16x128xf32, #tpu.memory_space<vmem>>) attributes {dimension_semantics = [#tpu.dimension_semantics<parallel>], iteration_bounds = array<i64: 1>, scalar_prefetch = 0 : i64, scratch_operands = 0 : i64, tpu.core_type = #tpu.core_type<tc>, window_params = [{transform_indices = @transform_0, window_bounds = array<i64: 16, 128>}, {pipeline_mode = #tpu.pipeline_mode<synchronous>, transform_indices = @transform_1, window_bounds = array<i64: 128, 128>}, {pipeline_mode = #tpu.pipeline_mode<synchronous>, transform_indices = @transform_2, window_bounds = array<i64: 128, 128>}, {pipeline_mode = #tpu.pipeline_mode<synchronous>, transform_indices = @transform_3, window_bounds = array<i64: 128, 128>}, {pipeline_mode = #tpu.pipeline_mode<synchronous>, transform_indices = @transform_4, window_bounds = array<i64: 3, 128>}, {transform_indices = @transform_5, window_bounds = array<i64: 16, 128>}]} {
    %c0 = arith.constant 0 : index
    %c0_0 = arith.constant 0 : index
    %0 = vector.load %arg1[%c0, %c0_0] : memref<16x128xbf16, #tpu.memory_space<vmem>>, vector<16x128xbf16>
    %c0_1 = arith.constant 0 : index
    %c0_2 = arith.constant 0 : index
    %1 = vector.load %arg2[%c0_1, %c0_2] : memref<128x128xbf16, #tpu.memory_space<vmem>>, vector<128x128xbf16>
    %c0_3 = arith.constant 0 : index
    %c0_4 = arith.constant 0 : index
    %2 = vector.load %arg5[%c0_3, %c0_4] : memref<3x128xf32, #tpu.memory_space<vmem>>, vector<1x128xf32>
    %cst = arith.constant dense<0.000000e+00> : vector<16x128xf32>
    %3 = tpu.matmul %0, %1, %cst {dimension_numbers = #tpu.dot_dimension_numbers<[1], [0], [0], [1], [0, 0, 1, 1], [], []>} : vector<16x128xbf16>, vector<128x128xbf16>, vector<16x128xf32> -> vector<16x128xf32>
    %4 = vector.broadcast %2 : vector<1x128xf32> to vector<16x128xf32>
    %5 = arith.addf %3, %4 : vector<16x128xf32>
    %cst_5 = arith.constant 0.000000e+00 : f32
    %6 = vector.broadcast %cst_5 : f32 to vector<16x128xf32>
    %7 = arith.maximumf %5, %6 : vector<16x128xf32>
    %8 = arith.truncf %7 : vector<16x128xf32> to vector<16x128xbf16>
    %c0_6 = arith.constant 0 : index
    %c0_7 = arith.constant 0 : index
    %9 = vector.load %arg3[%c0_6, %c0_7] : memref<128x128xbf16, #tpu.memory_space<vmem>>, vector<128x128xbf16>
    %c1 = arith.constant 1 : index
    %c0_8 = arith.constant 0 : index
    %10 = vector.load %arg5[%c1, %c0_8] : memref<3x128xf32, #tpu.memory_space<vmem>>, vector<1x128xf32>
    %cst_9 = arith.constant dense<0.000000e+00> : vector<16x128xf32>
    %11 = tpu.matmul %8, %9, %cst_9 {dimension_numbers = #tpu.dot_dimension_numbers<[1], [0], [0], [1], [0, 0, 1, 1], [], []>} : vector<16x128xbf16>, vector<128x128xbf16>, vector<16x128xf32> -> vector<16x128xf32>
    %12 = vector.broadcast %10 : vector<1x128xf32> to vector<16x128xf32>
    %13 = arith.addf %11, %12 : vector<16x128xf32>
    %cst_10 = arith.constant 0.000000e+00 : f32
    %14 = vector.broadcast %cst_10 : f32 to vector<16x128xf32>
    %15 = arith.maximumf %13, %14 : vector<16x128xf32>
    %16 = arith.truncf %15 : vector<16x128xf32> to vector<16x128xbf16>
    %c0_11 = arith.constant 0 : index
    %c0_12 = arith.constant 0 : index
    %17 = vector.load %arg4[%c0_11, %c0_12] : memref<128x128xbf16, #tpu.memory_space<vmem>>, vector<128x128xbf16>
    %c2 = arith.constant 2 : index
    %c0_13 = arith.constant 0 : index
    %18 = vector.load %arg5[%c2, %c0_13] : memref<3x128xf32, #tpu.memory_space<vmem>>, vector<1x128xf32>
    %cst_14 = arith.constant dense<0.000000e+00> : vector<16x128xf32>
    %19 = tpu.matmul %16, %17, %cst_14 {dimension_numbers = #tpu.dot_dimension_numbers<[1], [0], [0], [1], [0, 0, 1, 1], [], []>} : vector<16x128xbf16>, vector<128x128xbf16>, vector<16x128xf32> -> vector<16x128xf32>
    %20 = vector.broadcast %18 : vector<1x128xf32> to vector<16x128xf32>
    %21 = arith.addf %19, %20 : vector<16x128xf32>
    %cst_15 = arith.constant 5.000000e-01 : f32
    %22 = vector.broadcast %cst_15 : f32 to vector<16x128xf32>
    %23 = arith.mulf %22, %21 : vector<16x128xf32>
    %24 = math.tanh %23 : vector<16x128xf32>
    %cst_16 = arith.constant 5.000000e-01 : f32
    %25 = vector.broadcast %cst_16 : f32 to vector<16x128xf32>
    %26 = arith.mulf %25, %24 : vector<16x128xf32>
    %cst_17 = arith.constant 5.000000e-01 : f32
    %27 = vector.broadcast %cst_17 : f32 to vector<16x128xf32>
    %28 = arith.addf %26, %27 : vector<16x128xf32>
    %c0_18 = arith.constant 0 : index
    %c0_19 = arith.constant 0 : index
    %29 = vector.load %arg6[%c0_18, %c0_19] : memref<16x128xf32, #tpu.memory_space<vmem>>, vector<16x128xf32>
    tpu.vector_store %arg6[%c0_18, %c0_19], %28 {strides = array<i32>} : memref<16x128xf32, #tpu.memory_space<vmem>>, vector<16x128xf32>,
    return
  }
  func.func @transform_0(%arg0: i32) -> (i32, i32) {
    %c0_i32 = arith.constant 0 : i32
    %c0_i32_0 = arith.constant 0 : i32
    return %arg0, %c0_i32 : i32, i32
  }
  func.func @transform_1(%arg0: i32) -> (i32, i32) {
    %c0_i32 = arith.constant 0 : i32
    %c0_i32_0 = arith.constant 0 : i32
    %c0_i32_1 = arith.constant 0 : i32
    return %c0_i32, %c0_i32_0 : i32, i32
  }
  func.func @transform_2(%arg0: i32) -> (i32, i32) {
    %c0_i32 = arith.constant 0 : i32
    %c0_i32_0 = arith.constant 0 : i32
    %c0_i32_1 = arith.constant 0 : i32
    return %c0_i32, %c0_i32_0 : i32, i32
  }
  func.func @transform_3(%arg0: i32) -> (i32, i32) {
    %c0_i32 = arith.constant 0 : i32
    %c0_i32_0 = arith.constant 0 : i32
    %c0_i32_1 = arith.constant 0 : i32
    return %c0_i32, %c0_i32_0 : i32, i32
  }
  func.func @transform_4(%arg0: i32) -> (i32, i32) {
    %c0_i32 = arith.constant 0 : i32
    %c0_i32_0 = arith.constant 0 : i32
    %c0_i32_1 = arith.constant 0 : i32
    return %c0_i32, %c0_i32_0 : i32, i32
  }
  func.func @transform_5(%arg0: i32) -> (i32, i32) {
    %c0_i32 = arith.constant 0 : i32
    %c0_i32_0 = arith.constant 0 : i32
    return %arg0, %c0_i32 : i32, i32
  }
}

</mosaic_0001>

<bundles_post_ra>
// kernel: tpu_custom_call.1
= control target key start
LH: loop header
LB: loop body
LE: loop exit
PB: predicated region body
PF: predicated region fallthrough
CT: control target
= control target key end

     0   :  { %10 = vsyncpa [#allocation3], 0  ;;  %s820_s0 = inlined_call_operand.hbm [shape: bf16[16,128], index: 0, kind: input, shape index: {}]   ;;  %s821_s1 = inlined_call_operand.hbm [shape: bf16[128,128], index: 1, kind: input, shape index: {}]   ;;  %s822_s2 = inlined_call_operand.hbm [shape: bf16[128,128], index: 2, kind: input, shape index: {}]   ;;  %s823_s3 = inlined_call_operand.hbm [shape: bf16[128,128], index: 3, kind: input, shape index: {}]   ;;  %s824_s4 = inlined_call_operand.vmem [shape: f32[3,128], index: 4, kind: input, shape index: {}]   ;;  %s825_s5 = inlined_call_operand.hbm [shape: f32[16,128], index: 5, kind: output, shape index: {}]  }
   0x1   :  { %11 = vsyncpa [#allocation6], 0 }
   0x2   :  { %12 = vsyncpa [#allocation9], 0 }
   0x3   :  { %13 = vsyncpa [#allocation4], 0  ;;  %s713_s18 = smov [#allocation5]   ;;  %s714_s20 = smov [#allocation2]  }
   0x4   :  { %s31_s19 = sshll.u32 %s713_s18, 4  ;;  %s19_s21 = sshll.u32 %s714_s20, 4  ;;  %s32_s19 = int_to_ptr.vmem [resolvable:$true] %s31_s19  ;;  %s20_s21 = int_to_ptr.vmem [resolvable:$true] %s19_s21 }
   0x5   :  { %s613_s22 = scalar_lea.vmem %s32_s19, 1024  ;;  %p618_p1 = scmp.lt.s32.totalorder %s32_s19, %s32_s19 }
   0x6   :  { %p614_p0 = scmp.ne.s32.totalorder %s32_s19, %s613_s22  ;;  %p619_p2 = scmp.lt.s32.totalorder %s613_s22, %s613_s22 }
   0x8   :  { %p620_p3 = por %p619_p2, %p618_p1 }
   0xa   :  { %p621_p4 = pnand %p620_p3, %p614_p0 }
   0xc   :  { %624 = shalt.err (!%p621_p4)
}
   0xd   :  { %s715_s23 = smov 64   ;;  %s716_s24 = smov 4  }
   0xe   :  { %37 = dma.hbm_to_vmem [thread:$0]  %s821_s1, 1024, %s32_s19, [#allocation6], %s715_s23, %s715_s23, %s716_s24  }
   0xf   :  { %s633_s27 = scalar_lea.vmem %s20_s21, 128  ;;  %p638_p6 = scmp.lt.s32.totalorder %s20_s21, %s20_s21 }
  0x10   :  { %p634_p5 = scmp.ne.s32.totalorder %s20_s21, %s633_s27  ;;  %p639_p7 = scmp.lt.s32.totalorder %s633_s27, %s633_s27 }
  0x12   :  { %p640_p8 = por %p639_p7, %p638_p6 }
  0x14   :  { %p641_p9 = pnand %p640_p8, %p634_p5 }
  0x16   :  { %644 = shalt.err (!%p641_p9)
}
  0x17   :  { %25 = dma.hbm_to_vmem [thread:$0]  %s820_s0, 128, %s20_s21, [#allocation3], %s715_s23, %s715_s23, %s716_s24  }
  0x18   :  { %s717_s30 = smov [#allocation7]   ;;  %s718_s7 = smov [#allocation8]  }
  0x19   :  { %s43_s6 = sshll.u32 %s717_s30, 4  ;;  %s55_s8 = sshll.u32 %s718_s7, 4  ;;  %s44_s6 = int_to_ptr.vmem [resolvable:$true] %s43_s6  ;;  %s56_s8 = int_to_ptr.vmem [resolvable:$true] %s55_s8 }
  0x1a   :  { %s653_s1 = scalar_lea.vmem %s44_s6, 1024  ;;  %p658_p11 = scmp.lt.s32.totalorder %s44_s6, %s44_s6 }
  0x1b   :  { %p654_p10 = scmp.ne.s32.totalorder %s44_s6, %s653_s1  ;;  %p659_p12 = scmp.lt.s32.totalorder %s653_s1, %s653_s1 }
  0x1d   :  { %p660_p13 = por %p659_p12, %p658_p11 }
  0x1f   :  { %p661_p0 = pnand %p660_p13, %p654_p10 }
  0x21   :  { %664 = shalt.err (!%p661_p0)
}
  0x22   :  { %49 = dma.hbm_to_vmem [thread:$0]  %s822_s2, 1024, %s44_s6, [#allocation6], %s715_s23, %s715_s23, %s716_s24  }
  0x23   :  { %s673_s0 = scalar_lea.vmem %s56_s8, 1024  ;;  %p678_p2 = scmp.lt.s32.totalorder %s56_s8, %s56_s8 }
  0x24   :  { %p674_p1 = scmp.ne.s32.totalorder %s56_s8, %s673_s0  ;;  %p679_p3 = scmp.lt.s32.totalorder %s673_s0, %s673_s0 }
  0x26   :  { %p680_p4 = por %p679_p3, %p678_p2 }
  0x28   :  { %p681_p5 = pnand %p680_p4, %p674_p1 }
  0x2a   :  { %684 = shalt.err (!%p681_p5)
}
  0x2b   :  { %61 = dma.hbm_to_vmem [thread:$0]  %s823_s3, 1024, %s56_s8, [#allocation9], %s715_s23, %s715_s23, %s716_s24  }
  0x2c   :  { %705 = dma.done.wait [#allocation3], 128  }
  0x2d   :  { %706 = vsyncadd [#allocation3], 4294967168 }
  0x2e   :  { %707 = dma.done.wait [#allocation6], 2048  }
  0x2f   :  { %708 = vsyncadd [#allocation6], 4294965248 }
  0x30   :  { %709 = dma.done.wait [#allocation9], 1024  }
  0x31   :  { %710 = vsyncadd [#allocation9], 4294966272  ;;  %v719_v0 = vmov 0.0   ;;  %vm720_vm0 = vmmov 0   ;;  %v576_v1 = vld [vmem:[#allocation5 + $0x38] sm:$0xff]   ;;  %v577_v2 = vld [vmem:[#allocation5 + $0x30] sm:$0xff]  }
  0x32   :  { %505 = vmatprep.subr.bf16.mxu0 %v719_v0  ;;  %521 = vmatprep.mubr.msk.bf16.mxu0 %vm720_vm0, %v719_v0  ;;  %v578_v3 = vld [vmem:[#allocation5 + $0x28] sm:$0xff]   ;;  %v585_v4 = vld [vmem:[#allocation7 + $0x38] sm:$0xff]   ;;  %v579_v5 = vld [vmem:[#allocation5 + $0x20] sm:$0xff]   ;;  %s721_s17 = smov [#allocation10]  }
  0x33   :  { %525 = vmatprep.subr.bf16.mxu1 %v719_v0  ;;  %541 = vmatprep.mubr.msk.bf16.mxu1 %vm720_vm0, %v719_v0  ;;  %v586_v6 = vld [vmem:[#allocation7 + $0x30] sm:$0xff]   ;;  %v580_v7 = vld [vmem:[#allocation5 + $0x18] sm:$0xff]   ;;  %v587_v8 = vld [vmem:[#allocation7 + $0x28] sm:$0xff]   ;;  %s436_s18 = sshll.u32 %s721_s17, 4  ;;  %s437_s18 = int_to_ptr.vmem [resolvable:$true] %s436_s18 }
  0x34   :  { %506 = vmatpush3.bf16.msra.mxu0 %v576_v1  ;;  %526 = vmatpush3.bf16.msra.mxu1 %v585_v4  ;;  %v581_v9 = vld [vmem:[#allocation5 + $0x10] sm:$0xff]   ;;  %v588_v10 = vld [vmem:[#allocation7 + $0x20] sm:$0xff]   ;;  %v582_v11 = vld [vmem:[#allocation5 + $0x8] sm:$0xff]   ;;  %p690_p7 = scmp.lt.s32.totalorder %s437_s18, %s437_s18 }
  0x35   :  { %507 = vmatprep.subr.bf16.mxu0 %v719_v0  ;;  %527 = vmatprep.subr.bf16.mxu1 %v719_v0  ;;  %v589_v12 = vld [vmem:[#allocation7 + $0x18] sm:$0xff]   ;;  %v583_v13 = vld [vmem:[#allocation5] sm:$0xff]   ;;  %v590_v15 = vld [vmem:[#allocation7 + $0x10] sm:$0xff]  }
  0x36   :  { %v584_v14 = vld [vmem:[#allocation2] sm:$0xff]   ;;  %v591_v16 = vld [vmem:[#allocation7 + $0x8] sm:$0xff]   ;;  %v592_v17 = vld [vmem:[#allocation7] sm:$0xff]  }
  0x37   :  { %v593_v18 = vld [vmem:[#allocation8 + $0x38] sm:$0xff]   ;;  %v594_v19 = vld [vmem:[#allocation8 + $0x30] sm:$0xff]   ;;  %v595_v20 = vld [vmem:[#allocation8 + $0x28] sm:$0xff]  }
  0x38   :  { %508 = vmatpush3.bf16.msra.mxu0 %v577_v2  ;;  %528 = vmatpush3.bf16.msra.mxu1 %v586_v6  ;;  %v596_v21 = vld [vmem:[#allocation8 + $0x20] sm:$0xff]   ;;  %v597_v22 = vld [vmem:[#allocation8 + $0x18] sm:$0xff]   ;;  %v598_v33 = vld [vmem:[#allocation8 + $0x10] sm:$0xff]  }
  0x39   :  { %509 = vmatprep.subr.bf16.mxu0 %v719_v0  ;;  %529 = vmatprep.subr.bf16.mxu1 %v719_v0  ;;  %v450_v23 = vld [vmem:[%s824_s4] ss:$0 sm:$0xff]  ;;  %v599_v34 = vld [vmem:[#allocation8 + $0x8] sm:$0xff]   ;;  %v600_v35 = vld [vmem:[#allocation8] sm:$0xff]  }
  0x3a   :  { %v460_v36 = vld [vmem:[%s824_s4 + $0x1] ss:$0 sm:$0xff]  ;;  %v469_v46 = vld [vmem:[%s824_s4 + $0x2] ss:$0 sm:$0xff]  ;;  %s685_s4 = scalar_lea.vmem %s437_s18, 256 }
  0x3b   :  { %p686_p6 = scmp.ne.s32.totalorder %s437_s18, %s685_s4  ;;  %p691_p8 = scmp.lt.s32.totalorder %s685_s4, %s685_s4 }
  0x3c   :  { %510 = vmatpush3.bf16.msra.mxu0 %v578_v3  ;;  %530 = vmatpush3.bf16.msra.mxu1 %v587_v8 }
  0x3d   :  { %511 = vmatprep.subr.bf16.mxu0 %v719_v0  ;;  %531 = vmatprep.subr.bf16.mxu1 %v719_v0  ;;  %p692_p9 = por %p691_p8, %p690_p7 }
  0x3f   :  { %p693_p10 = pnand %p692_p9, %p686_p6 }
  0x40   :  { %512 = vmatpush3.bf16.msra.mxu0 %v579_v5  ;;  %532 = vmatpush3.bf16.msra.mxu1 %v588_v10 }
  0x41   :  { %513 = vmatprep.subr.bf16.mxu0 %v719_v0  ;;  %533 = vmatprep.subr.bf16.mxu1 %v719_v0 }
  0x44   :  { %514 = vmatpush3.bf16.msra.mxu0 %v580_v7  ;;  %534 = vmatpush3.bf16.msra.mxu1 %v589_v12 }
  0x45   :  { %515 = vmatprep.subr.bf16.mxu0 %v719_v0  ;;  %535 = vmatprep.subr.bf16.mxu1 %v719_v0 }
  0x48   :  { %516 = vmatpush3.bf16.msra.mxu0 %v581_v9  ;;  %536 = vmatpush3.bf16.msra.mxu1 %v590_v15 }
  0x49   :  { %517 = vmatprep.subr.bf16.mxu0 %v719_v0  ;;  %537 = vmatprep.subr.bf16.mxu1 %v719_v0 }
  0x4c   :  { %518 = vmatpush3.bf16.msra.mxu0 %v582_v11  ;;  %538 = vmatpush3.bf16.msra.mxu1 %v591_v16 }
  0x4d   :  { %519 = vmatprep.subr.bf16.mxu0 %v719_v0  ;;  %539 = vmatprep.subr.bf16.mxu1 %v719_v0 }
  0x50   :  { %520 = vmatpush3.bf16.msra.mxu0 %v583_v13  ;;  %540 = vmatpush3.bf16.msra.mxu1 %v592_v17 }
  0x51   :  { %545 = vmatprep.subr.bf16.mxu0 %v719_v0 }
  0x53   :  { %522 = vmatmul.mubr.bf16.vlgmr.msra.gmra.mxu0 %v584_v14 }
  0x54   :  { %561 = vmatprep.mubr.msk.bf16.mxu0 %vm720_vm0, %v719_v0  ;;  %546 = vmatpush3.bf16.msra.mxu0 %v593_v18 }
  0x55   :  { %547 = vmatprep.subr.bf16.mxu0 %v719_v0 }
  0x58   :  { %548 = vmatpush3.bf16.msra.mxu0 %v594_v19 }
  0x59   :  { %549 = vmatprep.subr.bf16.mxu0 %v719_v0 }
  0x5c   :  { %550 = vmatpush3.bf16.msra.mxu0 %v595_v20 }
  0x5d   :  { %551 = vmatprep.subr.bf16.mxu0 %v719_v0 }
  0x60   :  { %552 = vmatpush3.bf16.msra.mxu0 %v596_v21 }
  0x61   :  { %553 = vmatprep.subr.bf16.mxu0 %v719_v0 }
  0x64   :  { %554 = vmatpush3.bf16.msra.mxu0 %v597_v22 }
  0x65   :  { %555 = vmatprep.subr.bf16.mxu0 %v719_v0 }
  0x68   :  { %556 = vmatpush3.bf16.msra.mxu0 %v598_v33 }
  0x69   :  { %557 = vmatprep.subr.bf16.mxu0 %v719_v0 }
  0x6c   :  { %558 = vmatpush3.bf16.msra.mxu0 %v599_v34 }
  0x6d   :  { %559 = vmatprep.subr.bf16.mxu0 %v719_v0 }
  0x70   :  { %560 = vmatpush3.bf16.msra.mxu0 %v600_v35 }
 0x113   :  { %v188_v24 = vpop.f32.mrf.mxu0 }
 0x114   :  { %v189_v26 = vadd.f32 %v450_v23, %v188_v24 }
 0x115   :  { %v523_v25 = vpop.f32.mrf.mxu0 }
 0x116   :  { %v195_v30 = vmax.f32 %v189_v26, 0.0 }
 0x117   :  { %v191_v27 = vpop.f32.mrf.mxu0 }
 0x118   :  { %v192_v28 = vadd.f32 %v450_v23, %v191_v27 }
 0x119   :  { %v524_v29 = vpop.f32.mrf.mxu0 }
 0x11a   :  { %v196_v31 = vmax.f32 %v192_v28, 0.0 }
 0x11c   :  { %v197_v32 = vpack.c.bf16 %v196_v31, %v195_v30 }
 0x11e   :  { %542 = vmatmul.mubr.bf16.vlgmr.msra.gmra.mxu1 %v197_v32 }
 0x1de   :  { %v301_v37 = vpop.f32.mrf.mxu1 }
 0x1df   :  { %v302_v39 = vadd.f32 %v460_v36, %v301_v37 }
 0x1e0   :  { %v543_v38 = vpop.f32.mrf.mxu1 }
 0x1e1   :  { %v308_v43 = vmax.f32 %v302_v39, 0.0 }
 0x1e2   :  { %v304_v40 = vpop.f32.mrf.mxu1 }
 0x1e3   :  { %v305_v41 = vadd.f32 %v460_v36, %v304_v40 }
 0x1e4   :  { %v544_v42 = vpop.f32.mrf.mxu1 }
 0x1e5   :  { %v309_v44 = vmax.f32 %v305_v41, 0.0 }
 0x1e7   :  { %v310_v45 = vpack.c.bf16 %v309_v44, %v308_v43 }
 0x1e9   :  { %562 = vmatmul.mubr.bf16.vlgmr.msra.gmra.mxu0 %v310_v45 }
 0x2a9   :  { %v414_v47 = vpop.f32.mrf.mxu0 }
 0x2aa   :  { %v415_v48 = vadd.f32 %v469_v46, %v414_v47 }
 0x2ab   :  { %v563_v49 = vpop.f32.mrf.mxu0 }
 0x2ac   :  { %v421_v50 = vmul.f32 0.5, %v415_v48 }
 0x2ad   :  { %v417_v51 = vpop.f32.mrf.mxu0 }
 0x2ae   :  { %601 = vtanh.f32 %v421_v50  ;;  %v418_v52 = vadd.f32 %v469_v46, %v417_v51 }
 0x2af   :  { %v564_v53 = vpop.f32.mrf.mxu0 }
 0x2b0   :  { %v422_v54 = vmul.f32 0.5, %v418_v52 }
 0x2b2   :  { %603 = vtanh.f32 %v422_v54 }
 0x2bb   :  { %v602_v55 = vpop.eup %601 }
 0x2bc   :  { %v425_v56 = vmul.f32 0.5, %v602_v55 }
 0x2be   :  { %v427_v57 = vadd.f32 0.5, %v425_v56 }
 0x2bf   :  { %v604_v58 = vpop.eup %603 }
 0x2c0   :  { %429 = vst [vmem:[#allocation10] sm:$0xff] %v427_v57  ;;  %v426_v59 = vmul.f32 0.5, %v604_v58 }
 0x2c2   :  { %v428_v60 = vadd.f32 0.5, %v426_v59 }
 0x2c4   :  { %430 = vst [vmem:[#allocation10 + $0x8] sm:$0xff] %v428_v60 }
 0x2c5   :  { %696 = shalt.err (!%p693_p10)
}
 0x2c6   :  { %s722_s19 = smov 128   ;;  %s723_s20 = smov 8  }
 0x2c7   :  { %442 = dma.vmem_to_hbm [thread:$0]  %s437_s18, 256, %s825_s5, [#allocation4], %s722_s19, %s722_s19, %s723_s20  }
 0x2c8   :  { %711 = dma.done.wait [#allocation4], 256  }
 0x2c9   :  { %712 = vsyncadd [#allocation4], 4294967040 }
 0x2ca   :  { %446 = vsyncpa [#allocation3], 1 }
 0x2cb   :  { %447 = vsyncpa [#allocation6], 1 }
 0x2cc   :  { %448 = vsyncpa [#allocation9], 1 }
 0x2cd   :  { %449 = vsyncpa [#allocation4], 1 }

// kernel: tpu_custom_call.1
= control target key start
LH: loop header
LB: loop body
LE: loop exit
PB: predicated region body
PF: predicated region fallthrough
CT: control target
= control target key end

     0   :  { %10 = vsyncpa [#allocation3], 0  ;;  %s820_s0 = inlined_call_operand.hbm [shape: bf16[16,128], index: 0, kind: input, shape index: {}]   ;;  %s821_s1 = inlined_call_operand.hbm [shape: bf16[128,128], index: 1, kind: input, shape index: {}]   ;;  %s822_s2 = inlined_call_operand.hbm [shape: bf16[128,128], index: 2, kind: input, shape index: {}]   ;;  %s823_s3 = inlined_call_operand.hbm [shape: bf16[128,128], index: 3, kind: input, shape index: {}]   ;;  %s824_s4 = inlined_call_operand.vmem [shape: f32[3,128], index: 4, kind: input, shape index: {}]   ;;  %s825_s5 = inlined_call_operand.hbm [shape: f32[16,128], index: 5, kind: output, shape index: {}]  }
   0x1   :  { %11 = vsyncpa [#allocation6], 0 }
   0x2   :  { %12 = vsyncpa [#allocation9], 0 }
   0x3   :  { %13 = vsyncpa [#allocation4], 0  ;;  %s713_s18 = smov [#allocation5]   ;;  %s714_s20 = smov [#allocation2]  }
   0x4   :  { %s31_s19 = sshll.u32 %s713_s18, 4  ;;  %s19_s21 = sshll.u32 %s714_s20, 4  ;;  %s32_s19 = int_to_ptr.vmem [resolvable:$true] %s31_s19  ;;  %s20_s21 = int_to_ptr.vmem [resolvable:$true] %s19_s21 }
   0x5   :  { %s613_s22 = scalar_lea.vmem %s32_s19, 1024  ;;  %p618_p1 = scmp.lt.s32.totalorder %s32_s19, %s32_s19 }
   0x6   :  { %p614_p0 = scmp.ne.s32.totalorder %s32_s19, %s613_s22  ;;  %p619_p2 = scmp.lt.s32.totalorder %s613_s22, %s613_s22 }
   0x8   :  { %p620_p3 = por %p619_p2, %p618_p1 }
   0xa   :  { %p621_p4 = pnand %p620_p3, %p614_p0 }
   0xc   :  { %624 = shalt.err (!%p621_p4)
}
   0xd   :  { %s715_s23 = smov 64   ;;  %s716_s24 = smov 4  }
   0xe   :  { %37 = dma.hbm_to_vmem [thread:$0]  %s821_s1, 1024, %s32_s19, [#allocation6], %s715_s23, %s715_s23, %s716_s24  }
   0xf   :  { %s633_s27 = scalar_lea.vmem %s20_s21, 128  ;;  %p638_p6 = scmp.lt.s32.totalorder %s20_s21, %s20_s21 }
  0x10   :  { %p634_p5 = scmp.ne.s32.totalorder %s20_s21, %s633_s27  ;;  %p639_p7 = scmp.lt.s32.totalorder %s633_s27, %s633_s27 }
  0x12   :  { %p640_p8 = por %p639_p7, %p638_p6 }
  0x14   :  { %p641_p9 = pnand %p640_p8, %p634_p5 }
  0x16   :  { %644 = shalt.err (!%p641_p9)
}
  0x17   :  { %25 = dma.hbm_to_vmem [thread:$0]  %s820_s0, 128, %s20_s21, [#allocation3], %s715_s23, %s715_s23, %s716_s24  }
  0x18   :  { %s717_s30 = smov [#allocation7]   ;;  %s718_s7 = smov [#allocation8]  }
  0x19   :  { %s43_s6 = sshll.u32 %s717_s30, 4  ;;  %s55_s8 = sshll.u32 %s718_s7, 4  ;;  %s44_s6 = int_to_ptr.vmem [resolvable:$true] %s43_s6  ;;  %s56_s8 = int_to_ptr.vmem [resolvable:$true] %s55_s8 }
  0x1a   :  { %s653_s1 = scalar_lea.vmem %s44_s6, 1024  ;;  %p658_p11 = scmp.lt.s32.totalorder %s44_s6, %s44_s6 }
  0x1b   :  { %p654_p10 = scmp.ne.s32.totalorder %s44_s6, %s653_s1  ;;  %p659_p12 = scmp.lt.s32.totalorder %s653_s1, %s653_s1 }
  0x1d   :  { %p660_p13 = por %p659_p12, %p658_p11 }
  0x1f   :  { %p661_p0 = pnand %p660_p13, %p654_p10 }
  0x21   :  { %664 = shalt.err (!%p661_p0)
}
  0x22   :  { %49 = dma.hbm_to_vmem [thread:$0]  %s822_s2, 1024, %s44_s6, [#allocation6], %s715_s23, %s715_s23, %s716_s24  }
  0x23   :  { %s673_s0 = scalar_lea.vmem %s56_s8, 1024  ;;  %p678_p2 = scmp.lt.s32.totalorder %s56_s8, %s56_s8 }
  0x24   :  { %p674_p1 = scmp.ne.s32.totalorder %s56_s8, %s673_s0  ;;  %p679_p3 = scmp.lt.s32.totalorder %s673_s0, %s673_s0 }
  0x26   :  { %p680_p4 = por %p679_p3, %p678_p2 }
  0x28   :  { %p681_p5 = pnand %p680_p4, %p674_p1 }
  0x2a   :  { %684 = shalt.err (!%p681_p5)
}
  0x2b   :  { %61 = dma.hbm_to_vmem [thread:$0]  %s823_s3, 1024, %s56_s8, [#allocation9], %s715_s23, %s715_s23, %s716_s24  }
  0x2c   :  { %705 = dma.done.wait [#allocation3], 128  }
  0x2d   :  { %706 = vsyncadd [#allocation3], 4294967168 }
  0x2e   :  { %707 = dma.done.wait [#allocation6], 2048  }
  0x2f   :  { %708 = vsyncadd [#allocation6], 4294965248 }
  0x30   :  { %709 = dma.done.wait [#allocation9], 1024  }
  0x31   :  { %710 = vsyncadd [#allocation9], 4294966272  ;;  %v719_v0 = vmov 0.0   ;;  %vm720_vm0 = vmmov 0   ;;  %v576_v1 = vld [vmem:[#allocation5 + $0x38] sm:$0xff]   ;;  %v577_v2 = vld [vmem:[#allocation5 + $0x30] sm:$0xff]  }
  0x32   :  { %505 = vmatprep.subr.bf16.mxu0 %v719_v0  ;;  %521 = vmatprep.mubr.msk.bf16.mxu0 %vm720_vm0, %v719_v0  ;;  %v578_v3 = vld [vmem:[#allocation5 + $0x28] sm:$0xff]   ;;  %v585_v4 = vld [vmem:[#allocation7 + $0x38] sm:$0xff]   ;;  %v579_v5 = vld [vmem:[#allocation5 + $0x20] sm:$0xff]   ;;  %s721_s17 = smov [#allocation10]  }
  0x33   :  { %525 = vmatprep.subr.bf16.mxu1 %v719_v0  ;;  %541 = vmatprep.mubr.msk.bf16.mxu1 %vm720_vm0, %v719_v0  ;;  %v586_v6 = vld [vmem:[#allocation7 + $0x30] sm:$0xff]   ;;  %v580_v7 = vld [vmem:[#allocation5 + $0x18] sm:$0xff]   ;;  %v587_v8 = vld [vmem:[#allocation7 + $0x28] sm:$0xff]   ;;  %s436_s18 = sshll.u32 %s721_s17, 4  ;;  %s437_s18 = int_to_ptr.vmem [resolvable:$true] %s436_s18 }
  0x34   :  { %506 = vmatpush3.bf16.msra.mxu0 %v576_v1  ;;  %526 = vmatpush3.bf16.msra.mxu1 %v585_v4  ;;  %v581_v9 = vld [vmem:[#allocation5 + $0x10] sm:$0xff]   ;;  %v588_v10 = vld [vmem:[#allocation7 + $0x20] sm:$0xff]   ;;  %v582_v11 = vld [vmem:[#allocation5 + $0x8] sm:$0xff]   ;;  %p690_p7 = scmp.lt.s32.totalorder %s437_s18, %s437_s18 }
  0x35   :  { %507 = vmatprep.subr.bf16.mxu0 %v719_v0  ;;  %527 = vmatprep.subr.bf16.mxu1 %v719_v0  ;;  %v589_v12 = vld [vmem:[#allocation7 + $0x18] sm:$0xff]   ;;  %v583_v13 = vld [vmem:[#allocation5] sm:$0xff]   ;;  %v590_v15 = vld [vmem:[#allocation7 + $0x10] sm:$0xff]  }
  0x36   :  { %v584_v14 = vld [vmem:[#allocation2] sm:$0xff]   ;;  %v591_v16 = vld [vmem:[#allocation7 + $0x8] sm:$0xff]   ;;  %v592_v17 = vld [vmem:[#allocation7] sm:$0xff]  }
  0x37   :  { %v593_v18 = vld [vmem:[#allocation8 + $0x38] sm:$0xff]   ;;  %v594_v19 = vld [vmem:[#allocation8 + $0x30] sm:$0xff]   ;;  %v595_v20 = vld [vmem:[#allocation8 + $0x28] sm:$0xff]  }
  0x38   :  { %508 = vmatpush3.bf16.msra.mxu0 %v577_v2  ;;  %528 = vmatpush3.bf16.msra.mxu1 %v586_v6  ;;  %v596_v21 = vld [vmem:[#allocation8 + $0x20] sm:$0xff]   ;;  %v597_v22 = vld [vmem:[#allocation8 + $0x18] sm:$0xff]   ;;  %v598_v33 = vld [vmem:[#allocation8 + $0x10] sm:$0xff]  }
  0x39   :  { %509 = vmatprep.subr.bf16.mxu0 %v719_v0  ;;  %529 = vmatprep.subr.bf16.mxu1 %v719_v0  ;;  %v450_v23 = vld [vmem:[%s824_s4] ss:$0 sm:$0xff]  ;;  %v599_v34 = vld [vmem:[#allocation8 + $0x8] sm:$0xff]   ;;  %v600_v35 = vld [vmem:[#allocation8] sm:$0xff]  }
  0x3a   :  { %v460_v36 = vld [vmem:[%s824_s4 + $0x1] ss:$0 sm:$0xff]  ;;  %v469_v46 = vld [vmem:[%s824_s4 + $0x2] ss:$0 sm:$0xff]  ;;  %s685_s4 = scalar_lea.vmem %s437_s18, 256 }
  0x3b   :  { %p686_p6 = scmp.ne.s32.totalorder %s437_s18, %s685_s4  ;;  %p691_p8 = scmp.lt.s32.totalorder %s685_s4, %s685_s4 }
  0x3c   :  { %510 = vmatpush3.bf16.msra.mxu0 %v578_v3  ;;  %530 = vmatpush3.bf16.msra.mxu1 %v587_v8 }
  0x3d   :  { %511 = vmatprep.subr.bf16.mxu0 %v719_v0  ;;  %531 = vmatprep.subr.bf16.mxu1 %v719_v0  ;;  %p692_p9 = por %p691_p8, %p690_p7 }
  0x3f   :  { %p693_p10 = pnand %p692_p9, %p686_p6 }
  0x40   :  { %512 = vmatpush3.bf16.msra.mxu0 %v579_v5  ;;  %532 = vmatpush3.bf16.msra.mxu1 %v588_v10 }
  0x41   :  { %513 = vmatprep.subr.bf16.mxu0 %v719_v0  ;;  %533 = vmatprep.subr.bf16.mxu1 %v719_v0 }
  0x44   :  { %514 = vmatpush3.bf16.msra.mxu0 %v580_v7  ;;  %534 = vmatpush3.bf16.msra.mxu1 %v589_v12 }
  0x45   :  { %515 = vmatprep.subr.bf16.mxu0 %v719_v0  ;;  %535 = vmatprep.subr.bf16.mxu1 %v719_v0 }
  0x48   :  { %516 = vmatpush3.bf16.msra.mxu0 %v581_v9  ;;  %536 = vmatpush3.bf16.msra.mxu1 %v590_v15 }
  0x49   :  { %517 = vmatprep.subr.bf16.mxu0 %v719_v0  ;;  %537 = vmatprep.subr.bf16.mxu1 %v719_v0 }
  0x4c   :  { %518 = vmatpush3.bf16.msra.mxu0 %v582_v11  ;;  %538 = vmatpush3.bf16.msra.mxu1 %v591_v16 }
  0x4d   :  { %519 = vmatprep.subr.bf16.mxu0 %v719_v0  ;;  %539 = vmatprep.subr.bf16.mxu1 %v719_v0 }
  0x50   :  { %520 = vmatpush3.bf16.msra.mxu0 %v583_v13  ;;  %540 = vmatpush3.bf16.msra.mxu1 %v592_v17 }
  0x51   :  { %545 = vmatprep.subr.bf16.mxu0 %v719_v0 }
  0x53   :  { %522 = vmatmul.mubr.bf16.vlgmr.msra.gmra.mxu0 %v584_v14 }
  0x54   :  { %561 = vmatprep.mubr.msk.bf16.mxu0 %vm720_vm0, %v719_v0  ;;  %546 = vmatpush3.bf16.msra.mxu0 %v593_v18 }
  0x55   :  { %547 = vmatprep.subr.bf16.mxu0 %v719_v0 }
  0x58   :  { %548 = vmatpush3.bf16.msra.mxu0 %v594_v19 }
  0x59   :  { %549 = vmatprep.subr.bf16.mxu0 %v719_v0 }
  0x5c   :  { %550 = vmatpush3.bf16.msra.mxu0 %v595_v20 }
  0x5d   :  { %551 = vmatprep.subr.bf16.mxu0 %v719_v0 }
  0x60   :  { %552 = vmatpush3.bf16.msra.mxu0 %v596_v21 }
  0x61   :  { %553 = vmatprep.subr.bf16.mxu0 %v719_v0 }
  0x64   :  { %554 = vmatpush3.bf16.msra.mxu0 %v597_v22 }
  0x65   :  { %555 = vmatprep.subr.bf16.mxu0 %v719_v0 }
  0x68   :  { %556 = vmatpush3.bf16.msra.mxu0 %v598_v33 }
  0x69   :  { %557 = vmatprep.subr.bf16.mxu0 %v719_v0 }
  0x6c   :  { %558 = vmatpush3.bf16.msra.mxu0 %v599_v34 }
  0x6d   :  { %559 = vmatprep.subr.bf16.mxu0 %v719_v0 }
  0x70   :  { %560 = vmatpush3.bf16.msra.mxu0 %v600_v35 }
 0x113   :  { %v188_v24 = vpop.f32.mrf.mxu0 }
 0x114   :  { %v189_v26 = vadd.f32 %v450_v23, %v188_v24 }
 0x115   :  { %v523_v25 = vpop.f32.mrf.mxu0 }
 0x116   :  { %v195_v30 = vmax.f32 %v189_v26, 0.0 }
 0x117   :  { %v191_v27 = vpop.f32.mrf.mxu0 }
 0x118   :  { %v192_v28 = vadd.f32 %v450_v23, %v191_v27 }
 0x119   :  { %v524_v29 = vpop.f32.mrf.mxu0 }
 0x11a   :  { %v196_v31 = vmax.f32 %v192_v28, 0.0 }
 0x11c   :  { %v197_v32 = vpack.c.bf16 %v196_v31, %v195_v30 }
 0x11e   :  { %542 = vmatmul.mubr.bf16.vlgmr.msra.gmra.mxu1 %v197_v32 }
 0x1de   :  { %v301_v37 = vpop.f32.mrf.mxu1 }
 0x1df   :  { %v302_v39 = vadd.f32 %v460_v36, %v301_v37 }
 0x1e0   :  { %v543_v38 = vpop.f32.mrf.mxu1 }
 0x1e1   :  { %v308_v43 = vmax.f32 %v302_v39, 0.0 }
 0x1e2   :  { %v304_v40 = vpop.f32.mrf.mxu1 }
 0x1e3   :  { %v305_v41 = vadd.f32 %v460_v36, %v304_v40 }
 0x1e4   :  { %v544_v42 = vpop.f32.mrf.mxu1 }
 0x1e5   :  { %v309_v44 = vmax.f32 %v305_v41, 0.0 }
 0x1e7   :  { %v310_v45 = vpack.c.bf16 %v309_v44, %v308_v43 }
 0x1e9   :  { %562 = vmatmul.mubr.bf16.vlgmr.msra.gmra.mxu0 %v310_v45 }
 0x2a9   :  { %v414_v47 = vpop.f32.mrf.mxu0 }
 0x2aa   :  { %v415_v48 = vadd.f32 %v469_v46, %v414_v47 }
 0x2ab   :  { %v563_v49 = vpop.f32.mrf.mxu0 }
 0x2ac   :  { %v421_v50 = vmul.f32 0.5, %v415_v48 }
 0x2ad   :  { %v417_v51 = vpop.f32.mrf.mxu0 }
 0x2ae   :  { %601 = vtanh.f32 %v421_v50  ;;  %v418_v52 = vadd.f32 %v469_v46, %v417_v51 }
 0x2af   :  { %v564_v53 = vpop.f32.mrf.mxu0 }
 0x2b0   :  { %v422_v54 = vmul.f32 0.5, %v418_v52 }
 0x2b2   :  { %603 = vtanh.f32 %v422_v54 }
 0x2bb   :  { %v602_v55 = vpop.eup %601 }
 0x2bc   :  { %v425_v56 = vmul.f32 0.5, %v602_v55 }
 0x2be   :  { %v427_v57 = vadd.f32 0.5, %v425_v56 }
 0x2bf   :  { %v604_v58 = vpop.eup %603 }
 0x2c0   :  { %429 = vst [vmem:[#allocation10] sm:$0xff] %v427_v57  ;;  %v426_v59 = vmul.f32 0.5, %v604_v58 }
 0x2c2   :  { %v428_v60 = vadd.f32 0.5, %v426_v59 }
 0x2c4   :  { %430 = vst [vmem:[#allocation10 + $0x8] sm:$0xff] %v428_v60 }
 0x2c5   :  { %696 = shalt.err (!%p693_p10)
}
 0x2c6   :  { %s722_s19 = smov 128   ;;  %s723_s20 = smov 8  }
 0x2c7   :  { %442 = dma.vmem_to_hbm [thread:$0]  %s437_s18, 256, %s825_s5, [#allocation4], %s722_s19, %s722_s19, %s723_s20  }
 0x2c8   :  { %711 = dma.done.wait [#allocation4], 256  }
 0x2c9   :  { %712 = vsyncadd [#allocation4], 4294967040 }
 0x2ca   :  { %446 = vsyncpa [#allocation3], 1 }
 0x2cb   :  { %447 = vsyncpa [#allocation6], 1 }
 0x2cc   :  { %448 = vsyncpa [#allocation9], 1 }
 0x2cd   :  { %449 = vsyncpa [#allocation4], 1 }

</bundles_post_ra>
